<compile_context>
chip_gen: v7x
topology: tpu7x:2x2x1
jax: 0.10.0
libtpu: 0.0.40
codegen_flags: <defaults>
</compile_context>

<pallas_src>
import jax
import jax.numpy as jnp
from jax.experimental import pallas as pl
from jax.experimental.pallas import tpu as pltpu


_SUBLANE = 8  # f32 sublane multiple for the streamed batch tile


def _make_disc_loss_kernel(true_b, tm):
    """Per-batch-tile kernel: masked per-tile partial sum of softplus(-pred)."""

    def kernel(x_ref, w1_ref, b1_ref, w2_ref, b2_ref, psum_ref):
        i = pl.program_id(0)

        # in-kernel bf16 cast (hidden under the x DMA), MXU matmul, f32 accumulation
        x = x_ref[...].astype(jnp.bfloat16)                                    # [TM, D]
        h = jnp.dot(x, w1_ref[...], preferred_element_type=jnp.float32)        # [TM, HP]
        h = h + b1_ref[...]
        h = jnp.where(h >= 0.0, h, 0.2 * h)                                    # LeakyReLU(0.2)

        # layer 2 (HID -> 1): broadcast-mul + lane reduce on VPU/XLU rather than
        # an N=1 MXU matmul.  Padded HID lanes have w2 == 0 so they contribute 0.
        pred = jnp.sum(h * w2_ref[...], axis=-1, keepdims=True) + b2_ref[...]  # [TM, 1]

        # numerically-stable softplus(-pred)
        z = -pred
        sp = jnp.maximum(z, 0.0) + jnp.log1p(jnp.exp(-jnp.abs(z)))

        # mask out-of-bounds rows of the (possibly ragged) last tile BEFORE the
        # cross-row reduction so garbage/NaN rows never reach the sum.
        row = i * tm + jax.lax.broadcasted_iota(jnp.int32, sp.shape, 0)
        sp = jnp.where(row < true_b, sp, 0.0)

        # per-tile partial sum, stored in element [0, 0] of a full lane-dense
        # (8, 128) block -> one unmasked vst per grid step.
        psum = jnp.sum(sp)
        r = jax.lax.broadcasted_iota(jnp.int32, (1, _SUBLANE, 128), 1)
        c = jax.lax.broadcasted_iota(jnp.int32, (1, _SUBLANE, 128), 2)
        psum_ref[...] = jnp.where((r == 0) & (c == 0), psum, 0.0)

    return kernel


def _vmem_capacity_bytes(default=64 * 1024 * 1024):
    """Generation-aware VMEM capacity query (falls back to a v7x-safe 64 MiB)."""
    try:
        info = pltpu.get_tpu_info()
        for name in ("vmem_capacity_bytes", "vmem_bytes", "vmem_size_bytes"):
            v = getattr(info, name, None)
            if v:
                return int(v)
    except Exception:
        pass
    return default


def discriminator_loss(x_nchw, w1, b1, w2, b2, *, tm_cap=512):
    B = x_nchw.shape[0]
    xf = x_nchw.reshape(B, -1).astype(jnp.float32)   # [B, D]; reshape only, no extra HBM pass
    D = xf.shape[1]
    HID = w1.shape[1]

    # pad HID to exactly one 128-lane tile multiple (zero columns contribute nothing)
    HID_pad = max(128, pl.cdiv(HID, 128) * 128)

    # ---- batch-tile sizing (generation-aware VMEM budget) --------------------
    vmem_cap = _vmem_capacity_bytes()
    vmem_limit = int(vmem_cap * 0.6)                  # explicit scoped limit with headroom
    # resident operands, budgeted as double-buffered so it also holds on v7x/v5e
    # TODO(synk): single-buffer the constant-index resident specs with
    # pipeline_mode=pl.Buffered(1) to free more VMEM on v7x's 64 MiB.
    w_resident = 2 * (D * HID_pad * 2 + 2 * HID_pad * 4 + 4)
    x_budget = max(0, vmem_limit - w_resident - (2 << 20))       # headroom for out/scratch
    tm_vmem = max(_SUBLANE, (x_budget // (2 * D * 4)) // _SUBLANE * _SUBLANE)
    # keep >=4 grid steps when B allows it (>=2 pipelined steps per v7x TensorCore)
    tm_batch = max(_SUBLANE, pl.cdiv(pl.cdiv(B, 4), _SUBLANE) * _SUBLANE)
    TM = max(_SUBLANE, min(tm_cap, tm_vmem, tm_batch) // _SUBLANE * _SUBLANE)
    grid = pl.cdiv(B, TM)                             # ragged last tile; masked in-kernel
    # TODO(synk): for D*HID_pad too large to keep w1 resident, add a trailing
    # "arbitrary" K grid axis over D with an f32 [TM, HID_pad] accumulator scratch.

    # small one-time weight prep (negligible vs. x streaming)
    w1_p = jnp.zeros((D, HID_pad), jnp.bfloat16).at[:, :HID].set(w1.astype(jnp.bfloat16))
    b1_p = jnp.zeros((1, HID_pad), jnp.float32).at[:, :HID].set(
        b1.reshape(1, HID).astype(jnp.float32))
    w2_p = jnp.zeros((1, HID_pad), jnp.float32).at[:, :HID].set(
        w2.reshape(1, HID).astype(jnp.float32))
    b2_p = b2.reshape(1, 1).astype(jnp.float32)

    cost = pl.CostEstimate(
        flops=2 * B * D * HID_pad + 6 * B * HID_pad,
        transcendentals=2 * B,
        bytes_accessed=B * D * 4 + D * HID_pad * 2 + (2 * HID_pad + 1) * 4
        + grid * _SUBLANE * 128 * 4,
    )

    psums = pl.pallas_call(
        _make_disc_loss_kernel(B, TM),
        out_shape=jax.ShapeDtypeStruct((grid, _SUBLANE, 128), jnp.float32),
        grid=(grid,),
        in_specs=[
            pl.BlockSpec((TM, D), lambda i: (i, 0)),        # streamed f32 x tiles
            pl.BlockSpec((D, HID_pad), lambda i: (0, 0)),   # resident matmul weight (bf16)
            pl.BlockSpec((1, HID_pad), lambda i: (0, 0)),   # b1 (f32)
            pl.BlockSpec((1, HID_pad), lambda i: (0, 0)),   # w2 (f32)
            pl.BlockSpec((1, 1), lambda i: (0, 0)),         # b2 (f32)
        ],
        # per-tile lane-dense partial-sum block
        out_specs=pl.BlockSpec((1, _SUBLANE, 128), lambda i: (i, 0, 0)),
        compiler_params=pltpu.CompilerParams(
            dimension_semantics=("parallel",),
            vmem_limit_bytes=vmem_limit,
        ),
        cost_estimate=cost,
    )(xf, w1_p, b1_p, w2_p, b2_p)

    # final mean over the TRUE batch size (per-tile partials already masked)
    return jnp.sum(psums) / B


def _reference_loss(x_nchw, w1, b1, w2, b2):
    B = x_nchw.shape[0]
    xf = x_nchw.reshape(B, -1).astype(jnp.float32)
    h = xf @ w1 + b1
    h = jnp.where(h >= 0.0, h, 0.2 * h)
    pred = h @ w2 + b2
    return jnp.mean(jax.nn.softplus(-pred))


if __name__ == "__main__":
    key = jax.random.PRNGKey(0)
    kx, k1, kb1, k2, kb2 = jax.random.split(key, 5)

    # small shapes consistent with the module's NCHW conv-style input
    B, C, H, W = 2, 4, 16, 16
    D = C * H * W
    HID = 32

    x = jax.random.normal(kx, (B, C, H, W), dtype=jnp.float32)

    # deterministic synthetic discriminator parameters (non-zero biases so the
    # bias broadcast and the ragged-row masking are actually exercised)
    w1 = 0.02 * jax.random.normal(k1, (D, HID), dtype=jnp.float32)
    b1 = 0.05 * jax.random.normal(kb1, (1, HID), dtype=jnp.float32)
    w2 = 0.02 * jax.random.normal(k2, (HID, 1), dtype=jnp.float32)
    b2 = 0.10 * jax.random.normal(kb2, (1, 1), dtype=jnp.float32)

    loss = discriminator_loss(x, w1, b1, w2, b2)
    jax.block_until_ready(loss)

    ref = _reference_loss(x, w1, b1, w2, b2)
    # bf16 matmul operands -> loosen tolerance slightly vs. the pure-f32 reference
    assert jnp.allclose(loss, ref, atol=5e-3, rtol=5e-3), (loss, ref)

    print("KERNEL_OK")
</pallas_src>

<mosaic_0001>
module attributes {stable_mosaic.version = 11 : i64} {
  func.func @kernel(%arg0: i32, %arg1: memref<8x1024xf32, #tpu.memory_space<vmem>>, %arg2: memref<1024x128xbf16, #tpu.memory_space<vmem>>, %arg3: memref<1x128xf32, #tpu.memory_space<vmem>>, %arg4: memref<1x128xf32, #tpu.memory_space<vmem>>, %arg5: memref<1x1xf32, #tpu.memory_space<vmem>>, %arg6: memref<1x8x128xf32, #tpu.memory_space<vmem>>) attributes {dimension_semantics = [#tpu.dimension_semantics<parallel>], iteration_bounds = array<i64: 1>, scalar_prefetch = 0 : i64, scratch_operands = 0 : i64, tpu.core_type = #tpu.core_type<tc>, window_params = [{transform_indices = @transform_0, window_bounds = array<i64: 8, 1024>}, {pipeline_mode = #tpu.pipeline_mode<synchronous>, transform_indices = @transform_1, window_bounds = array<i64: 1024, 128>}, {pipeline_mode = #tpu.pipeline_mode<synchronous>, transform_indices = @transform_2, window_bounds = array<i64: 1, 128>}, {pipeline_mode = #tpu.pipeline_mode<synchronous>, transform_indices = @transform_3, window_bounds = array<i64: 1, 128>}, {pipeline_mode = #tpu.pipeline_mode<synchronous>, transform_indices = @transform_4, window_bounds = array<i64: 1, 1>}, {transform_indices = @transform_5, window_bounds = array<i64: 1, 8, 128>}]} {
    %c0 = arith.constant 0 : index
    %c0_0 = arith.constant 0 : index
    %0 = vector.load %arg1[%c0, %c0_0] : memref<8x1024xf32, #tpu.memory_space<vmem>>, vector<8x1024xf32>
    %1 = arith.truncf %0 : vector<8x1024xf32> to vector<8x1024xbf16>
    %c0_1 = arith.constant 0 : index
    %c0_2 = arith.constant 0 : index
    %2 = vector.load %arg2[%c0_1, %c0_2] : memref<1024x128xbf16, #tpu.memory_space<vmem>>, vector<1024x128xbf16>
    %cst = arith.constant dense<0.000000e+00> : vector<8x128xf32>
    %3 = tpu.matmul %1, %2, %cst {dimension_numbers = #tpu.dot_dimension_numbers<[1], [0], [0], [1], [0, 0, 1, 1], [], []>} : vector<8x1024xbf16>, vector<1024x128xbf16>, vector<8x128xf32> -> vector<8x128xf32>
    %c0_3 = arith.constant 0 : index
    %c0_4 = arith.constant 0 : index
    %4 = vector.load %arg3[%c0_3, %c0_4] : memref<1x128xf32, #tpu.memory_space<vmem>>, vector<1x128xf32>
    %5 = vector.broadcast %4 : vector<1x128xf32> to vector<8x128xf32>
    %6 = arith.addf %3, %5 : vector<8x128xf32>
    %cst_5 = arith.constant 0.000000e+00 : f32
    %7 = vector.broadcast %cst_5 : f32 to vector<8x128xf32>
    %8 = arith.cmpf oge, %6, %7 : vector<8x128xf32>
    %cst_6 = arith.constant 2.000000e-01 : f32
    %9 = vector.broadcast %cst_6 : f32 to vector<8x128xf32>
    %10 = arith.mulf %9, %6 : vector<8x128xf32>
    %11 = arith.select %8, %6, %10 : vector<8x128xi1>, vector<8x128xf32>
    %c0_7 = arith.constant 0 : index
    %c0_8 = arith.constant 0 : index
    %12 = vector.load %arg4[%c0_7, %c0_8] : memref<1x128xf32, #tpu.memory_space<vmem>>, vector<1x128xf32>
    %13 = vector.broadcast %12 : vector<1x128xf32> to vector<8x128xf32>
    %14 = arith.mulf %11, %13 : vector<8x128xf32>
    %cst_9 = arith.constant dense<0.000000e+00> : vector<8xf32>
    %15 = vector.multi_reduction <add>, %14, %cst_9 [1] : vector<8x128xf32> to vector<8xf32>
    %16 = vector.shape_cast %15 : vector<8xf32> to vector<8x1xf32>
    %c0_10 = arith.constant 0 : index
    %c0_11 = arith.constant 0 : index
    %17 = vector.load %arg5[%c0_10, %c0_11] : memref<1x1xf32, #tpu.memory_space<vmem>>, vector<1x1xf32>
    %18 = vector.broadcast %17 : vector<1x1xf32> to vector<8x1xf32>
    %19 = arith.addf %16, %18 : vector<8x1xf32>
    %cst_12 = arith.constant 0.000000e+00 : f32
    %20 = vector.broadcast %cst_12 : f32 to vector<8x1xf32>
    %21 = arith.subf %20, %19 : vector<8x1xf32>
    %cst_13 = arith.constant 0.000000e+00 : f32
    %22 = vector.broadcast %cst_13 : f32 to vector<8x1xf32>
    %23 = arith.maximumf %21, %22 : vector<8x1xf32>
    %24 = math.absf %21 : vector<8x1xf32>
    %cst_14 = arith.constant 0.000000e+00 : f32
    %25 = vector.broadcast %cst_14 : f32 to vector<8x1xf32>
    %26 = arith.subf %25, %24 : vector<8x1xf32>
    %27 = math.exp %26 : vector<8x1xf32>
    %28 = math.log1p %27 : vector<8x1xf32>
    %29 = arith.addf %23, %28 : vector<8x1xf32>
    %c8_i32 = arith.constant 8 : i32
    %30 = arith.muli %arg0, %c8_i32 : i32
    %31 = tpu.iota {dimensions = array<i32: 0>} : vector<8x1xi32>
    %32 = vector.broadcast %30 : i32 to vector<8x1xi32>
    %33 = arith.addi %32, %31 : vector<8x1xi32>
    %c2_i32 = arith.constant 2 : i32
    %34 = vector.broadcast %c2_i32 : i32 to vector<8x1xi32>
    %35 = arith.cmpi slt, %33, %34 : vector<8x1xi32>
    %cst_15 = arith.constant 0.000000e+00 : f32
    %36 = vector.broadcast %cst_15 : f32 to vector<8x1xf32>
    %37 = arith.select %35, %29, %36 : vector<8x1xi1>, vector<8x1xf32>
    %38 = vector.shape_cast %37 : vector<8x1xf32> to vector<1x8x1xf32>
    %cst_16 = arith.constant dense<0.000000e+00> : vector<1xf32>
    %39 = vector.multi_reduction <add>, %38, %cst_16 [1, 2] : vector<1x8x1xf32> to vector<1xf32>
    %40 = vector.shape_cast %39 : vector<1xf32> to vector<1x1x1xf32>
    %41 = vector.extract %40[0, 0, 0] : f32 from vector<1x1x1xf32>
    %42 = tpu.iota {dimensions = array<i32: 1>} : vector<1x8x128xi32>
    %43 = tpu.iota {dimensions = array<i32: 2>} : vector<1x8x128xi32>
    %c0_i32 = arith.constant 0 : i32
    %44 = vector.broadcast %c0_i32 : i32 to vector<1x8x128xi32>
    %45 = arith.cmpi eq, %42, %44 : vector<1x8x128xi32>
    %c0_i32_17 = arith.constant 0 : i32
    %46 = vector.broadcast %c0_i32_17 : i32 to vector<1x8x128xi32>
    %47 = arith.cmpi eq, %43, %46 : vector<1x8x128xi32>
    %48 = arith.andi %45, %47 : vector<1x8x128xi1>
    %cst_18 = arith.constant 0.000000e+00 : f32
    %49 = vector.broadcast %41 : f32 to vector<1x8x128xf32>
    %50 = vector.broadcast %cst_18 : f32 to vector<1x8x128xf32>
    %51 = arith.select %48, %49, %50 : vector<1x8x128xi1>, vector<1x8x128xf32>
    %c0_19 = arith.constant 0 : index
    %c0_20 = arith.constant 0 : index
    %c0_21 = arith.constant 0 : index
    %52 = vector.load %arg6[%c0_19, %c0_20, %c0_21] : memref<1x8x128xf32, #tpu.memory_space<vmem>>, vector<1x8x128xf32>
    tpu.vector_store %arg6[%c0_19, %c0_20, %c0_21], %51 {strides = array<i32>} : memref<1x8x128xf32, #tpu.memory_space<vmem>>, vector<1x8x128xf32>,
    return
  }
  func.func @transform_0(%arg0: i32) -> (i32, i32) {
    %c0_i32 = arith.constant 0 : i32
    %c0_i32_0 = arith.constant 0 : i32
    return %arg0, %c0_i32 : i32, i32
  }
  func.func @transform_1(%arg0: i32) -> (i32, i32) {
    %c0_i32 = arith.constant 0 : i32
    %c0_i32_0 = arith.constant 0 : i32
    %c0_i32_1 = arith.constant 0 : i32
    return %c0_i32, %c0_i32_0 : i32, i32
  }
  func.func @transform_2(%arg0: i32) -> (i32, i32) {
    %c0_i32 = arith.constant 0 : i32
    %c0_i32_0 = arith.constant 0 : i32
    %c0_i32_1 = arith.constant 0 : i32
    return %c0_i32, %c0_i32_0 : i32, i32
  }
  func.func @transform_3(%arg0: i32) -> (i32, i32) {
    %c0_i32 = arith.constant 0 : i32
    %c0_i32_0 = arith.constant 0 : i32
    %c0_i32_1 = arith.constant 0 : i32
    return %c0_i32, %c0_i32_0 : i32, i32
  }
  func.func @transform_4(%arg0: i32) -> (i32, i32) {
    %c0_i32 = arith.constant 0 : i32
    %c0_i32_0 = arith.constant 0 : i32
    %c0_i32_1 = arith.constant 0 : i32
    return %c0_i32, %c0_i32_0 : i32, i32
  }
  func.func @transform_5(%arg0: i32) -> (i32, i32, i32) {
    %c0_i32 = arith.constant 0 : i32
    %c0_i32_0 = arith.constant 0 : i32
    %c0_i32_1 = arith.constant 0 : i32
    return %arg0, %c0_i32, %c0_i32_0 : i32, i32, i32
  }
}

</mosaic_0001>

<bundles_post_ra>
// kernel: tpu_custom_call.1
= control target key start
LH: loop header
LB: loop body
LE: loop exit
PB: predicated region body
PF: predicated region fallthrough
CT: control target
= control target key end

     0   :  { %s1331_s0 = inlined_call_operand.hbm [shape: f32[2,1024], index: 0, kind: input, shape index: {}]   ;;  %s1332_s1 = inlined_call_operand.hbm [shape: bf16[1024,128], index: 1, kind: input, shape index: {}]   ;;  %s1333_s2 = inlined_call_operand.vmem [shape: f32[1,128], index: 2, kind: input, shape index: {}]   ;;  %s1334_s3 = inlined_call_operand.vmem [shape: f32[1,128], index: 3, kind: input, shape index: {}]   ;;  %s1335_s4 = inlined_call_operand.<no memory space> [shape: f32[1,1], index: 4, kind: input, shape index: {}]   ;;  %s1336_s5 = inlined_call_operand.hbm [shape: f32[1,8,128], index: 5, kind: output, shape index: {}]  }
   0x1   :  { %v10_v0 = vstv %s1335_s4 }
   0x2   :  { %11 = vst [vmem:[#allocation2] sm:$0x1] %v10_v0 }
   0x3   :  { %12 = vsyncpa [#allocation4], 0 }
   0x4   :  { %13 = vsyncpa [#allocation7], 0 }
   0x5   :  { %14 = vsyncpa [#allocation5], 0 }
   0x6   :  { %19 = vsyncadd [#allocation4], 768  ;;  %s1231_s20 = smov [#allocation3]   ;;  %s1159_s24 = scalar_lea.hbm %s1331_s0, 256 }
   0x7   :  { %s20_s21 = sshll.u32 %s1231_s20, 4  ;;  %p1160_p0 = scmp.ne.s32.totalorder %s1331_s0, %s1159_s24  ;;  %s21_s21 = int_to_ptr.vmem [resolvable:$true] %s20_s21 }
   0x8   :  { %p1163_p1 = scmp.lt.u32.totalorder %s1159_s24, %s1331_s0 }
   0xa   :  { %p1165_p2 = pnand %p1163_p1, %p1160_p0 }
   0xc   :  { %1168 = shalt.err (!%p1165_p2)
}
   0xd   :  { %s1169_s4 = scalar_lea.vmem %s21_s21, 256  ;;  %s1173_s29 = scalar_lea.vmem %s21_s21, 1024 }
   0xe   :  { %p1170_p3 = scmp.ne.s32.totalorder %s21_s21, %s1169_s4  ;;  %p1174_p4 = scmp.lt.s32.totalorder %s21_s21, %s21_s21 }
   0xf   :  { %p1175_p5 = scmp.lt.s32.totalorder %s1173_s29, %s1169_s4 }
  0x11   :  { %p1176_p6 = por %p1175_p5, %p1174_p4 }
  0x13   :  { %p1177_p7 = pnand %p1176_p6, %p1170_p3 }
  0x15   :  { %1180 = shalt.err (!%p1177_p7)
}
  0x16   :  { %s1232_s30 = smov 256   ;;  %s1233_s6 = smov 16  }
  0x17   :  { %26 = dma.hbm_to_vmem [thread:$0]  %s1331_s0, 256, %s21_s21, [#allocation4], %s1232_s30, %s1232_s30, %s1233_s6  }
  0x18   :  { %s1234_s9 = smov [#allocation6]   ;;  %s1181_s13 = scalar_lea.hbm %s1332_s1, 8192 }
  0x19   :  { %s32_s10 = sshll.u32 %s1234_s9, 4  ;;  %p1182_p8 = scmp.ne.s32.totalorder %s1332_s1, %s1181_s13  ;;  %s33_s10 = int_to_ptr.vmem [resolvable:$true] %s32_s10 }
  0x1a   :  { %p1185_p9 = scmp.lt.u32.totalorder %s1181_s13, %s1332_s1 }
  0x1c   :  { %p1187_p10 = pnand %p1185_p9, %p1182_p8 }
  0x1e   :  { %1190 = shalt.err (!%p1187_p10)
}
  0x1f   :  { %s1191_s18 = scalar_lea.vmem %s33_s10, 8192  ;;  %p1196_p12 = scmp.lt.s32.totalorder %s33_s10, %s33_s10 }
  0x20   :  { %p1192_p11 = scmp.ne.s32.totalorder %s33_s10, %s1191_s18  ;;  %p1197_p13 = scmp.lt.s32.totalorder %s1191_s18, %s1191_s18 }
  0x22   :  { %p1198_p0 = por %p1197_p13, %p1196_p12 }
  0x24   :  { %p1199_p1 = pnand %p1198_p0, %p1192_p11 }
  0x26   :  { %1202 = shalt.err (!%p1199_p1)
}
  0x27   :  { %s1235_s0 = smov 64   ;;  %s1236_s19 = smov 4  }
  0x28   :  { %38 = dma.hbm_to_vmem [thread:$0]  %s1332_s1, 8192, %s33_s10, [#allocation7], %s1235_s0, %s1235_s0, %s1236_s19  }
  0x29   :  { %1225 = dma.done.wait [#allocation4], 1024  }
  0x2a   :  { %1226 = vsyncadd [#allocation4], 4294966272 }
  0x2b   :  { %1227 = dma.done.wait [#allocation7], 8192  }
  0x2c   :  { %1228 = vsyncadd [#allocation7], 4294959104  ;;  %v1079_v1 = vld [vmem:[#allocation6 + $0x40] sm:$0xff]   ;;  %v1083_v5 = vld [vmem:[#allocation6 + $0x48] sm:$0xff]   ;;  %v1237_v25 = vmov 1983009808   ;;  %v75_v27 = vlaneseq }
  0x2d   :  { %v1080_v2 = vld [vmem:[#allocation6 + $0xc0] sm:$0xff]   ;;  %981 = vmatprep.subr.bf16.mxu0 %v1079_v1  ;;  %v1084_v6 = vld [vmem:[#allocation6 + $0xc8] sm:$0xff]   ;;  %v1087_v9 = vld [vmem:[#allocation6 + $0x50] sm:$0xff]   ;;  %v73_v26 = vunpack.c.l.s4 %v1237_v25  ;;  %vm879_vm3 = vcmask 7168  }
  0x2e   :  { %v1081_v3 = vld [vmem:[#allocation6] sm:$0xff]   ;;  %1003 = vmatprep.subr.bf16.mxu1 %v1080_v2  ;;  %v1085_v7 = vld [vmem:[#allocation6 + $0x8] sm:$0xff]   ;;  %v1088_v10 = vld [vmem:[#allocation6 + $0xd0] sm:$0xff]   ;;  %v1297_v33 = vshrl.u32 %v75_v27, 7 }
  0x2f   :  { %v1082_v4 = vld [vmem:[#allocation6 + $0x80] sm:$0xff]   ;;  %982 = vmatpush3.bf16.msra.mxu0 %v1081_v3  ;;  %v1086_v8 = vld [vmem:[#allocation6 + $0x88] sm:$0xff]   ;;  %v1089_v11 = vld [vmem:[#allocation6 + $0x10] sm:$0xff]   ;;  %v74_v32 = vunpack.c.0.s8 %v73_v26 }
  0x30   :  { %1004 = vmatpush3.bf16.msra.mxu1 %v1082_v4  ;;  %983 = vmatprep.subr.bf16.mxu0 %v1083_v5  ;;  %v1090_v12 = vld [vmem:[#allocation6 + $0x90] sm:$0xff]   ;;  %v1091_v13 = vld [vmem:[#allocation6 + $0x58] sm:$0xff]   ;;  %v1095_v17 = vld [vmem:[#allocation6 + $0x60] sm:$0xff]   ;;  %vm877_vm2 = vcmp.lt.s32.totalorder %v1297_v33, 2  ;;  %vm892_vm4 = vcmp.eq.s32.totalorder %v1297_v33, 0 }
  0x31   :  { %1005 = vmatprep.subr.bf16.mxu1 %v1084_v6  ;;  %v1092_v14 = vld [vmem:[#allocation6 + $0xd8] sm:$0xff]   ;;  %v1096_v18 = vld [vmem:[#allocation6 + $0xe0] sm:$0xff]   ;;  %v1099_v21 = vld [vmem:[#allocation6 + $0x68] sm:$0xff]   ;;  %v1300_v38 = vsub.s32 %v74_v32, %v1297_v33 }
  0x32   :  { %v1093_v15 = vld [vmem:[#allocation6 + $0x18] sm:$0xff]   ;;  %v1097_v19 = vld [vmem:[#allocation6 + $0x20] sm:$0xff]   ;;  %v1100_v22 = vld [vmem:[#allocation6 + $0xe8] sm:$0xff]  }
  0x33   :  { %984 = vmatpush3.bf16.msra.mxu0 %v1085_v7  ;;  %v1094_v16 = vld [vmem:[#allocation6 + $0x98] sm:$0xff]   ;;  %v1098_v20 = vld [vmem:[#allocation6 + $0xa0] sm:$0xff]   ;;  %v1101_v23 = vld [vmem:[#allocation6 + $0x28] sm:$0xff]  }
  0x34   :  { %1006 = vmatpush3.bf16.msra.mxu1 %v1086_v8  ;;  %985 = vmatprep.subr.bf16.mxu0 %v1087_v9  ;;  %v1102_v24 = vld [vmem:[#allocation6 + $0xa8] sm:$0xff]   ;;  %v1103_v28 = vld [vmem:[#allocation6 + $0x70] sm:$0xff]   ;;  %v1107_v34 = vld [vmem:[#allocation6 + $0x78] sm:$0xff]  }
  0x35   :  { %1007 = vmatprep.subr.bf16.mxu1 %v1088_v10  ;;  %v1104_v29 = vld [vmem:[#allocation6 + $0xf0] sm:$0xff]   ;;  %v1108_v35 = vld [vmem:[#allocation6 + $0xf8] sm:$0xff]   ;;  %v1117_v45 = vld [vmem:[#allocation6 + $0x140] sm:$0xff]  }
  0x36   :  { %v1105_v30 = vld [vmem:[#allocation6 + $0x30] sm:$0xff]   ;;  %v1109_v36 = vld [vmem:[#allocation6 + $0x38] sm:$0xff]   ;;  %v1118_v48 = vld [vmem:[#allocation6 + $0x1c0] sm:$0xff]  }
  0x37   :  { %986 = vmatpush3.bf16.msra.mxu0 %v1089_v11  ;;  %v1106_v31 = vld [vmem:[#allocation6 + $0xb0] sm:$0xff]   ;;  %v1110_v37 = vld [vmem:[#allocation6 + $0xb8] sm:$0xff]   ;;  %v1119_v51 = vld [vmem:[#allocation6 + $0x100] sm:$0xff]  }
  0x38   :  { %1008 = vmatpush3.bf16.msra.mxu1 %v1090_v12  ;;  %987 = vmatprep.subr.bf16.mxu0 %v1091_v13  ;;  %v1111_v39 = vld [vmem:[#allocation3] ss:$16 sps:$4 sm:$0xff]   ;;  %v1115_v41 = vld [vmem:[#allocation3 + $0x4] ss:$16 sps:$4 sm:$0xff]   ;;  %v1121_v57 = vld [vmem:[#allocation6 + $0x148] sm:$0xff]  }
  0x39   :  { %1009 = vmatprep.subr.bf16.mxu1 %v1092_v14  ;;  %v1113_v40 = vld [vmem:[#allocation3 + $0x20] ss:$16 sps:$4 sm:$0xff]   ;;  %v1116_v42 = vld [vmem:[#allocation3 + $0x24] ss:$16 sps:$4 sm:$0xff]   ;;  %v78_v43 = vrot.slane %v1111_v39, %v1300_v38  ;;  %v85_v46 = vrot.slane %v1115_v41, %v1300_v38  ;;  %v1122_v60 = vld [vmem:[#allocation6 + $0x1c8] sm:$0xff]  }
  0x3a   :  { %v92_v44 = vrot.slane %v1113_v40, %v1300_v38  ;;  %v99_v47 = vrot.slane %v1116_v42, %v1300_v38  ;;  %v1120_v54 = vld [vmem:[#allocation6 + $0x180] sm:$0xff]   ;;  %v1123_v61 = vld [vmem:[#allocation6 + $0x108] sm:$0xff]   ;;  %v1125_v63 = vld [vmem:[#allocation6 + $0x150] sm:$0xff]  }
  0x3b   :  { %988 = vmatpush3.bf16.msra.mxu0 %v1093_v15  ;;  %v1124_v62 = vld [vmem:[#allocation6 + $0x188] sm:$0xff]   ;;  %v1126_v0 = vld [vmem:[#allocation6 + $0x1d0] sm:$0xff]   ;;  %v1129_v3 = vld [vmem:[#allocation6 + $0x158] sm:$0xff]  }
  0x3c   :  { %1010 = vmatpush3.bf16.msra.mxu1 %v1094_v16  ;;  %989 = vmatprep.subr.bf16.mxu0 %v1095_v17  ;;  %v101_v49 = vcombine.high %v78_v43, %v92_v44  ;;  %v100_v50 = vcombine.low %v78_v43, %v92_v44  ;;  %v103_v52 = vcombine.high %v85_v46, %v99_v47  ;;  %v1127_v1 = vld [vmem:[#allocation6 + $0x110] sm:$0xff]   ;;  %v1130_v4 = vld [vmem:[#allocation6 + $0x1d8] sm:$0xff]   ;;  %v1133_v7 = vld [vmem:[#allocation6 + $0x160] sm:$0xff]  }
  0x3d   :  { %1011 = vmatprep.subr.bf16.mxu1 %v1096_v18  ;;  %v102_v53 = vcombine.low %v85_v46, %v99_v47  ;;  %v1128_v2 = vld [vmem:[#allocation6 + $0x190] sm:$0xff]   ;;  %v1131_v5 = vld [vmem:[#allocation6 + $0x118] sm:$0xff]   ;;  %v1134_v8 = vld [vmem:[#allocation6 + $0x1e0] sm:$0xff]  }
  0x3e   :  { %v149_v55 = vpack.c.bf16 %v101_v49, %v101_v49  ;;  %v148_v56 = vpack.c.bf16 %v100_v50, %v100_v50  ;;  %v151_v58 = vpack.c.bf16 %v103_v52, %v103_v52  ;;  %v1132_v6 = vld [vmem:[#allocation6 + $0x198] sm:$0xff]   ;;  %v1135_v9 = vld [vmem:[#allocation6 + $0x120] sm:$0xff]   ;;  %v1137_v11 = vld [vmem:[#allocation6 + $0x168] sm:$0xff]  }
  0x3f   :  { %990 = vmatpush3.bf16.msra.mxu0 %v1097_v19  ;;  %v150_v59 = vpack.c.bf16 %v102_v53, %v102_v53  ;;  %v1136_v10 = vld [vmem:[#allocation6 + $0x1a0] sm:$0xff]   ;;  %v1138_v12 = vld [vmem:[#allocation6 + $0x1e8] sm:$0xff]   ;;  %v1141_v15 = vld [vmem:[#allocation6 + $0x170] sm:$0xff]  }
  0x40   :  { %1012 = vmatpush3.bf16.msra.mxu1 %v1098_v20  ;;  %991 = vmatprep.subr.bf16.mxu0 %v1099_v21  ;;  %v1139_v13 = vld [vmem:[#allocation6 + $0x128] sm:$0xff]   ;;  %v1142_v16 = vld [vmem:[#allocation6 + $0x1f0] sm:$0xff]   ;;  %v1145_v19 = vld [vmem:[#allocation6 + $0x178] sm:$0xff]  }
  0x41   :  { %1013 = vmatprep.subr.bf16.mxu1 %v1100_v22  ;;  %707 = vmatprep.mubr.bf16.mxu0 %v149_v55  ;;  %v1140_v14 = vld [vmem:[#allocation6 + $0x1a8] sm:$0xff]   ;;  %v1143_v17 = vld [vmem:[#allocation6 + $0x130] sm:$0xff]   ;;  %v1146_v20 = vld [vmem:[#allocation6 + $0x1f8] sm:$0xff]  }
  0x42   :  { %747 = vmatprep.mubr.bf16.mxu1 %v151_v58  ;;  %v1144_v18 = vld [vmem:[#allocation6 + $0x1b0] sm:$0xff]   ;;  %v1147_v21 = vld [vmem:[#allocation6 + $0x138] sm:$0xff]  }
  0x43   :  { %992 = vmatpush3.bf16.msra.mxu0 %v1101_v23  ;;  %v1148_v22 = vld [vmem:[#allocation6 + $0x1b8] sm:$0xff]  }
  0x44   :  { %1014 = vmatpush3.bf16.msra.mxu1 %v1102_v24  ;;  %993 = vmatprep.subr.bf16.mxu0 %v1103_v28  ;;  %v1149_v23 = vld [vmem:[#allocation3 + $0x8] ss:$16 sps:$4 sm:$0xff]   ;;  %v1153_v25 = vld [vmem:[#allocation3 + $0xc] ss:$16 sps:$4 sm:$0xff]  }
  0x45   :  { %1015 = vmatprep.subr.bf16.mxu1 %v1104_v29  ;;  %v1151_v24 = vld [vmem:[#allocation3 + $0x28] ss:$16 sps:$4 sm:$0xff]   ;;  %v1154_v26 = vld [vmem:[#allocation3 + $0x2c] ss:$16 sps:$4 sm:$0xff]   ;;  %v114_v28 = vrot.slane %v1149_v23, %v1300_v38 }
  0x46   :  { %v128_v29 = vrot.slane %v1151_v24, %v1300_v38  ;;  %v914_v44 = vld [vmem:[%s1333_s2] ss:$0 sm:$0xff] }
  0x47   :  { %994 = vmatpush3.bf16.msra.mxu0 %v1105_v30  ;;  %v121_v30 = vrot.slane %v1153_v25, %v1300_v38 }
  0x48   :  { %1016 = vmatpush3.bf16.msra.mxu1 %v1106_v31  ;;  %995 = vmatprep.subr.bf16.mxu0 %v1107_v34  ;;  %v135_v31 = vrot.slane %v1154_v26, %v1300_v38  ;;  %v137_v32 = vcombine.high %v114_v28, %v128_v29  ;;  %v136_v34 = vcombine.low %v114_v28, %v128_v29 }
  0x49   :  { %1017 = vmatprep.subr.bf16.mxu1 %v1108_v35 }
  0x4a   :  { %v139_v35 = vcombine.high %v121_v30, %v135_v31  ;;  %v152_v39 = vpack.c.bf16 %v136_v34, %v136_v34 }
  0x4b   :  { %996 = vmatpush3.bf16.msra.mxu0 %v1109_v36  ;;  %v138_v36 = vcombine.low %v121_v30, %v135_v31 }
  0x4c   :  { %1018 = vmatpush3.bf16.msra.mxu1 %v1110_v37  ;;  %1025 = vmatprep.subr.bf16.mxu0 %v1117_v45  ;;  %v153_v37 = vpack.c.bf16 %v137_v32, %v137_v32  ;;  %v155_v40 = vpack.c.bf16 %v139_v35, %v139_v35  ;;  %v891_v35 = vand.u32 127, %v75_v27 }
  0x4d   :  { %1047 = vmatprep.subr.bf16.mxu1 %v1118_v48  ;;  %v154_v41 = vpack.c.bf16 %v138_v36, %v138_v36 }
  0x4e   :  { %708 = vmatmul.mubr.bf16.vlgmr.msra.gmra.mrb[0].mxu0 %v148_v56  ;;  %vm893_vm5 = vcmp.eq.s32.totalorder %v891_v35, 0 }
  0x4f   :  { %748 = vmatmul.mubr.bf16.vlgmr.msra.gmra.mrb[0].mxu1 %v150_v59  ;;  %1026 = vmatpush3.bf16.msra.mxu0 %v1119_v51  ;;  %vm894_vm6 = vmand %vm892_vm4, %vm893_vm5 }
  0x50   :  { %1048 = vmatpush3.bf16.msra.mxu1 %v1120_v54  ;;  %1027 = vmatprep.subr.bf16.mxu0 %v1121_v57 }
  0x51   :  { %1049 = vmatprep.subr.bf16.mxu1 %v1122_v60  ;;  %787 = vmatprep.mubr.bf16.mxu0 %v153_v37 }
  0x52   :  { %827 = vmatprep.mubr.bf16.mxu1 %v155_v40 }
  0x53   :  { %1028 = vmatpush3.bf16.msra.mxu0 %v1123_v61 }
  0x54   :  { %1050 = vmatpush3.bf16.msra.mxu1 %v1124_v62  ;;  %1029 = vmatprep.subr.bf16.mxu0 %v1125_v63 }
  0x55   :  { %1051 = vmatprep.subr.bf16.mxu1 %v1126_v0 }
  0x57   :  { %1030 = vmatpush3.bf16.msra.mxu0 %v1127_v1 }
  0x58   :  { %1052 = vmatpush3.bf16.msra.mxu1 %v1128_v2  ;;  %1031 = vmatprep.subr.bf16.mxu0 %v1129_v3  ;;  %v979_v3 = vld [vmem:[%s1334_s3] ss:$0 sm:$0xff]  ;;  %s1238_s3 = smov [#allocation8]  }
  0x59   :  { %1053 = vmatprep.subr.bf16.mxu1 %v1130_v4  ;;  %s904_s24 = sshll.u32 %s1238_s3, 4  ;;  %s905_s24 = int_to_ptr.vmem [resolvable:$true] %s904_s24 }
  0x5a   :  { %s1203_s26 = scalar_lea.vmem %s905_s24, 128  ;;  %p1208_p3 = scmp.lt.s32.totalorder %s905_s24, %s905_s24 }
  0x5b   :  { %1032 = vmatpush3.bf16.msra.mxu0 %v1131_v5  ;;  %p1204_p2 = scmp.ne.s32.totalorder %s905_s24, %s1203_s26  ;;  %p1209_p4 = scmp.lt.s32.totalorder %s1203_s26, %s1203_s26 }
  0x5c   :  { %1054 = vmatpush3.bf16.msra.mxu1 %v1132_v6  ;;  %1033 = vmatprep.subr.bf16.mxu0 %v1133_v7  ;;  %v980_v6 = vld [vmem:[#allocation2] ss:$0 sm:$0xff] }
  0x5d   :  { %1055 = vmatprep.subr.bf16.mxu1 %v1134_v8  ;;  %p1210_p5 = por %p1209_p4, %p1208_p3 }
  0x5f   :  { %1034 = vmatpush3.bf16.msra.mxu0 %v1135_v9  ;;  %p1211_p6 = pnand %p1210_p5, %p1204_p2 }
  0x60   :  { %1056 = vmatpush3.bf16.msra.mxu1 %v1136_v10  ;;  %1035 = vmatprep.subr.bf16.mxu0 %v1137_v11 }
  0x61   :  { %1057 = vmatprep.subr.bf16.mxu1 %v1138_v12 }
  0x63   :  { %1036 = vmatpush3.bf16.msra.mxu0 %v1139_v13 }
  0x64   :  { %1058 = vmatpush3.bf16.msra.mxu1 %v1140_v14  ;;  %1037 = vmatprep.subr.bf16.mxu0 %v1141_v15 }
  0x65   :  { %1059 = vmatprep.subr.bf16.mxu1 %v1142_v16 }
  0x67   :  { %1038 = vmatpush3.bf16.msra.mxu0 %v1143_v17 }
  0x68   :  { %1060 = vmatpush3.bf16.msra.mxu1 %v1144_v18  ;;  %1039 = vmatprep.subr.bf16.mxu0 %v1145_v19 }
  0x69   :  { %1061 = vmatprep.subr.bf16.mxu1 %v1146_v20 }
  0x6b   :  { %1040 = vmatpush3.bf16.msra.mxu0 %v1147_v21 }
  0x6c   :  { %1062 = vmatpush3.bf16.msra.mxu1 %v1148_v22 }
  0x6e   :  { %788 = vmatmul.mubr.bf16.vlgmr.msra.gmra.mrb[4].mxu0 %v152_v39 }
  0x6f   :  { %828 = vmatmul.mubr.bf16.vlgmr.msra.gmra.mrb[4].mxu1 %v154_v41 }
 0x121   :  { %v997_v42 = vpop.f32.mrb[0].mxu0 }
 0x122   :  { %v1019_v43 = vpop.f32.mrb[0].mxu1  ;;  %v998_v38 = vpop.f32.mrb[1].mxu0 }
 0x123   :  { %v999_v45 = vadd.f32 %v998_v38, %v997_v42  ;;  %v1020_v46 = vpop.f32.mrb[1].mxu1  ;;  %v1000_v47 = vpop.f32.mrb[2].mxu0 }
 0x124   :  { %v1021_v48 = vadd.f32 %v1020_v46, %v1019_v43  ;;  %v1022_v49 = vpop.f32.mrb[2].mxu1  ;;  %v1001_v50 = vpop.f32.mrb[3].mxu0 }
 0x125   :  { %v710_v51 = vadd.f32 %v999_v45, %v914_v44  ;;  %v1023_v52 = vpop.f32.mrb[3].mxu1 }
 0x127   :  { %v750_v53 = vadd.f32 %v1021_v48, %v710_v51 }
 0x141   :  { %v1041_v54 = vpop.f32.mrb[4].mxu0 }
 0x142   :  { %v1063_v55 = vpop.f32.mrb[4].mxu1  ;;  %v1042_v56 = vpop.f32.mrb[5].mxu0 }
 0x143   :  { %v1043_v57 = vadd.f32 %v1042_v56, %v1041_v54  ;;  %v1064_v58 = vpop.f32.mrb[5].mxu1  ;;  %v1044_v59 = vpop.f32.mrb[6].mxu0 }
 0x144   :  { %v1065_v60 = vadd.f32 %v1064_v58, %v1063_v55  ;;  %v1066_v61 = vpop.f32.mrb[6].mxu1  ;;  %v1045_v62 = vpop.f32.mrb[7].mxu0 }
 0x145   :  { %v790_v63 = vadd.f32 %v1043_v57, %v750_v53  ;;  %v1067_v0 = vpop.f32.mrb[7].mxu1 }
 0x147   :  { %v830_v1 = vadd.f32 %v1065_v60, %v790_v63 }
 0x149   :  { %vm835_vm0 = vcmp.ge.f32.partialorder %v830_v1, 0.0  ;;  %v836_v2 = vmul.f32 0.2, %v830_v1 }
 0x14b   :  { %v837_v4 = vsel %vm835_vm0, %v830_v1, %v836_v2 }
 0x14c   :  { %v845_v5 = vmul.f32 %v979_v3, %v837_v4 }
 0x14e   :  { %846 = vadd.xlane.f32.xlu0 %v845_v5 }
 0x1db   :  { %v847_v7 = vpop.xlane.xlu0 %846 }
 0x1dc   :  { %v855_v8 = vadd.f32 %v980_v6, %v847_v7 }
 0x1de   :  { %v856_v9 = vsub.f32 0.0, %v855_v8 }
 0x1e0   :  { %v858_v10 = vand.u32 2147483647, %v856_v9  ;;  %v857_v21 = vmax.f32 %v856_v9, 0.0 }
 0x1e2   :  { %v859_v11 = vsub.f32 0.0, %v858_v10 }
 0x1e4   :  { %v860_v12 = vmul.f32 1.442695, %v859_v11 }
 0x1e6   :  { %1155 = vpow2.f32 %v860_v12 }
 0x1f0   :  { %v1156_v13 = vpop.eup %1155 }
 0x1f1   :  { %v862_v14 = vadd.f32 1.0, %v1156_v13  ;;  %v865_v15 = vmul.f32 -0.5, %v1156_v13  ;;  %v868_v17 = vand.u32 2147483647, %v1156_v13 }
 0x1f3   :  { %1157 = vlog2.f32 %v862_v14  ;;  %v866_v16 = vadd.f32 1.0, %v865_v15  ;;  %vm869_vm1 = vcmp.lt.f32.partialorder %v868_v17, 0.0004427343 }
 0x1f5   :  { %v867_v20 = vmul.f32 %v1156_v13, %v866_v16 }
 0x1fd   :  { %v1158_v18 = vpop.eup %1157 }
 0x1fe   :  { %v864_v19 = vmul.f32 0.6931472, %v1158_v18 }
 0x200   :  { %v870_v22 = vsel %vm869_vm1, %v867_v20, %v864_v19 }
 0x201   :  { %v871_v23 = vadd.f32 %v870_v22, %v857_v21 }
 0x203   :  { %v878_v24 = vsel %vm877_vm2, %v871_v23, 0.0 }
 0x204   :  { %v880_v25 = vsel %vm879_vm3, %v878_v24, 0.0 }
 0x205   :  { %881 = vadd.xlane.f32.xlu0 %v880_v25 }
 0x292   :  { %v882_v26 = vpop.xlane.xlu0 %881 }
 0x293   :  { %v883_v28 = vrot.slane %v882_v26, 4 }
 0x295   :  { %v884_v29 = vadd.f32 %v883_v28, %v882_v26 }
 0x297   :  { %v885_v30 = vrot.slane %v884_v29, 2 }
 0x299   :  { %v886_v31 = vadd.f32 %v885_v30, %v884_v29 }
 0x29b   :  { %v887_v32 = vrot.slane %v886_v31, 1 }
 0x29d   :  { %v888_v34 = vadd.f32 %v887_v32, %v886_v31 }
 0x29f   :  { %1069 = vpush %v888_v34 }
 0x2d0   :  { %s1070_s25 = spop %1069 }
 0x2d1   :  { %v895_v36 = vstv %s1070_s25 }
 0x2d2   :  { %v896_v37 = vsel %vm894_vm6, %v895_v36, 0.0 }
 0x2d3   :  { %897 = vst [vmem:[#allocation8] sm:$0xff] %v896_v37 }
 0x2d4   :  { %1214 = shalt.err (!%p1211_p6)
}
 0x2d5   :  { %s1215_s4 = scalar_lea.hbm %s1336_s5, 128 }
 0x2d6   :  { %p1216_p7 = scmp.ne.s32.totalorder %s1336_s5, %s1215_s4  ;;  %p1219_p8 = scmp.lt.u32.totalorder %s1215_s4, %s1336_s5 }
 0x2d8   :  { %p1221_p9 = pnand %p1219_p8, %p1216_p7 }
 0x2da   :  { %1224 = shalt.err (!%p1221_p9)
}
 0x2db   :  { %907 = dma.vmem_to_hbm [thread:$0]  %s905_s24, 128, %s1336_s5, [#allocation5]  }
 0x2dc   :  { %1229 = dma.done.wait [#allocation5], 128  }
 0x2dd   :  { %1230 = vsyncadd [#allocation5], 4294967168 }
 0x2de   :  { %911 = vsyncpa [#allocation4], 1 }
 0x2df   :  { %912 = vsyncpa [#allocation7], 1 }
 0x2e0   :  { %913 = vsyncpa [#allocation5], 1 }

</bundles_post_ra>
